<compile_context>
chip_gen: v5e
topology: v5e:2x2
jax: 0.10.0
libtpu: 0.0.40
codegen_flags: <defaults>
</compile_context>

<pallas_src>
import jax
import jax.numpy as jnp
import numpy as np
from jax.experimental import pallas as pl
from jax.experimental.pallas import tpu as pltpu


def _ld_indp_kernel(x_ref, w1_ref, b1_ref, wout_ref, bout_ref, o_ref):
    # x_ref    : (B, N*L)    concatenated neighbor inputs
    # w1_ref   : (N*L, N*H)  block-diagonal of per-neighbor W1_n^T
    # b1_ref   : (1, N*H)    concatenated biases
    # wout_ref : (N*H, L)    wout^T (already matches concat order)
    # bout_ref : (1, L)
    # o_ref    : (B, L)
    h = jnp.dot(x_ref[...], w1_ref[...], preferred_element_type=jnp.float32)
    h = jnp.maximum(h + b1_ref[...], 0.0)
    o = jnp.dot(h, wout_ref[...], preferred_element_type=jnp.float32)
    o_ref[...] = (o + bout_ref[...]).astype(o_ref.dtype)


def ld_indp_pack_params(w1, b1, wout, bout):
    """One-time (offline) packing of PyTorch-layout params into fused form.

    w1   : (N, H, L)   per-neighbor Linear weight, PyTorch [out, in]
    b1   : (N, H)
    wout : (L, N*H)    output Linear weight, PyTorch [out, in]
    bout : (L,)
    """
    N, H, L = w1.shape
    w1_t = jnp.transpose(w1, (0, 2, 1))                      # (N, L, H) = W1_n^T
    # Block-diagonal (N*L, N*H): block (n, n) is W1_n^T.
    w1_bd = jax.scipy.linalg.block_diag(*[w1_t[n] for n in range(N)])
    b1_cat = b1.reshape(1, N * H)                             # concat order matches
    wout_t = jnp.transpose(wout)                              # (N*H, L)
    bout_2d = bout.reshape(1, L)
    return (
        jnp.asarray(w1_bd, jnp.float32),
        jnp.asarray(b1_cat, jnp.float32),
        jnp.asarray(wout_t, jnp.float32),
        jnp.asarray(bout_2d, jnp.float32),
    )


def ld_indp_forward_packed(x_cat, w1_bd, b1_cat, wout_t, bout_2d):
    B, NL = x_cat.shape
    NH = w1_bd.shape[1]
    L = wout_t.shape[1]
    assert w1_bd.shape == (NL, NH)
    assert b1_cat.shape == (1, NH)
    assert bout_2d.shape == (1, L)

    itemsize = 4  # all operands float32
    flops = 2 * B * NL * NH + 2 * B * NH * L
    bytes_accessed = itemsize * (
        x_cat.size + w1_bd.size + b1_cat.size + wout_t.size + bout_2d.size + B * L
    )
    cost = pl.CostEstimate(
        flops=flops, transcendentals=0, bytes_accessed=bytes_accessed
    )

    vmem = pltpu.MemorySpace.VMEM
    return pl.pallas_call(
        _ld_indp_kernel,
        out_shape=jax.ShapeDtypeStruct((B, L), jnp.float32),
        in_specs=[pl.BlockSpec(memory_space=vmem)] * 5,
        out_specs=pl.BlockSpec(memory_space=vmem),
        cost_estimate=cost,
    )(x_cat, w1_bd, b1_cat, wout_t, bout_2d)


def ld_indp_forward(ld_input, packed_params):
    """ld_input: (N, B, L). packed_params: output of ld_indp_pack_params."""
    N, B, L = ld_input.shape
    # (N, B, L) -> (B, N*L): column block n holds ld_input[n], matching the
    # block-diagonal weight layout and the reference's concat order.
    x_cat = jnp.transpose(ld_input, (1, 0, 2)).reshape(B, N * L)
    return ld_indp_forward_packed(x_cat, *packed_params)


def ld_indp_reference(ld_input, w1, b1, wout, bout):
    N = ld_input.shape[0]
    h1 = jnp.concatenate(
        [ld_input[i] @ w1[i].T + b1[i] for i in range(N)], axis=1)
    x = jnp.maximum(h1, 0.0)
    return x @ wout.T + bout


if __name__ == "__main__":
    # Small deterministic configuration.
    num_neighbs = 4
    batch = 8
    num_labels = 16
    h1_dim = 32

    key = jax.random.PRNGKey(0)
    k_x, k_w1, k_b1, k_wo, k_bo = jax.random.split(key, 5)

    # PyTorch-style Linear init: U(-1/sqrt(fan_in), 1/sqrt(fan_in)).
    k1 = 1.0 / np.sqrt(num_labels)
    ko = 1.0 / np.sqrt(h1_dim * num_neighbs)

    ld_input = jax.random.normal(k_x, (num_neighbs, batch, num_labels),
                                 dtype=jnp.float32)
    w1 = jax.random.uniform(k_w1, (num_neighbs, h1_dim, num_labels),
                            minval=-k1, maxval=k1, dtype=jnp.float32)
    b1 = jax.random.uniform(k_b1, (num_neighbs, h1_dim),
                            minval=-k1, maxval=k1, dtype=jnp.float32)
    wout = jax.random.uniform(k_wo, (num_labels, h1_dim * num_neighbs),
                              minval=-ko, maxval=ko, dtype=jnp.float32)
    bout = jax.random.uniform(k_bo, (num_labels,),
                              minval=-ko, maxval=ko, dtype=jnp.float32)

    # Pack weights once (would be done at parameter-init time in real use).
    packed = jax.block_until_ready(ld_indp_pack_params(w1, b1, wout, bout))

    out = ld_indp_forward(ld_input, packed)
    out = jax.block_until_ready(out)

    ref = ld_indp_reference(ld_input, w1, b1, wout, bout)
    np.testing.assert_allclose(np.asarray(out), np.asarray(ref),
                               rtol=1e-5, atol=1e-5)

    print("KERNEL_OK")
</pallas_src>

<mosaic_0001>
module attributes {stable_mosaic.version = 11 : i64} {
  func.func @_ld_indp_kernel(%arg0: memref<8x64xf32, #tpu.memory_space<vmem>>, %arg1: memref<64x128xf32, #tpu.memory_space<vmem>>, %arg2: memref<1x128xf32, #tpu.memory_space<vmem>>, %arg3: memref<128x16xf32, #tpu.memory_space<vmem>>, %arg4: memref<1x16xf32, #tpu.memory_space<vmem>>, %arg5: memref<8x16xf32, #tpu.memory_space<vmem>>) attributes {dimension_semantics = [], scalar_prefetch = 0 : i64, scratch_operands = 0 : i64, tpu.core_type = #tpu.core_type<tc>} {
    %c0 = arith.constant 0 : index
    %c0_0 = arith.constant 0 : index
    %0 = vector.load %arg0[%c0, %c0_0] : memref<8x64xf32, #tpu.memory_space<vmem>>, vector<8x64xf32>
    %c0_1 = arith.constant 0 : index
    %c0_2 = arith.constant 0 : index
    %1 = vector.load %arg1[%c0_1, %c0_2] : memref<64x128xf32, #tpu.memory_space<vmem>>, vector<64x128xf32>
    %cst = arith.constant dense<0.000000e+00> : vector<8x128xf32>
    %2 = tpu.matmul %0, %1, %cst {dimension_numbers = #tpu.dot_dimension_numbers<[1], [0], [0], [1], [0, 0, 1, 1], [], []>} : vector<8x64xf32>, vector<64x128xf32>, vector<8x128xf32> -> vector<8x128xf32>
    %c0_3 = arith.constant 0 : index
    %c0_4 = arith.constant 0 : index
    %3 = vector.load %arg2[%c0_3, %c0_4] : memref<1x128xf32, #tpu.memory_space<vmem>>, vector<1x128xf32>
    %4 = vector.broadcast %3 : vector<1x128xf32> to vector<8x128xf32>
    %5 = arith.addf %2, %4 : vector<8x128xf32>
    %cst_5 = arith.constant 0.000000e+00 : f32
    %6 = vector.broadcast %cst_5 : f32 to vector<8x128xf32>
    %7 = arith.maximumf %5, %6 : vector<8x128xf32>
    %c0_6 = arith.constant 0 : index
    %c0_7 = arith.constant 0 : index
    %8 = vector.load %arg3[%c0_6, %c0_7] : memref<128x16xf32, #tpu.memory_space<vmem>>, vector<128x16xf32>
    %cst_8 = arith.constant dense<0.000000e+00> : vector<8x16xf32>
    %9 = tpu.matmul %7, %8, %cst_8 {dimension_numbers = #tpu.dot_dimension_numbers<[1], [0], [0], [1], [0, 0, 1, 1], [], []>} : vector<8x128xf32>, vector<128x16xf32>, vector<8x16xf32> -> vector<8x16xf32>
    %c0_9 = arith.constant 0 : index
    %c0_10 = arith.constant 0 : index
    %10 = vector.load %arg4[%c0_9, %c0_10] : memref<1x16xf32, #tpu.memory_space<vmem>>, vector<1x16xf32>
    %11 = vector.broadcast %10 : vector<1x16xf32> to vector<8x16xf32>
    %12 = arith.addf %9, %11 : vector<8x16xf32>
    %c0_11 = arith.constant 0 : index
    %c0_12 = arith.constant 0 : index
    %13 = vector.load %arg5[%c0_11, %c0_12] : memref<8x16xf32, #tpu.memory_space<vmem>>, vector<8x16xf32>
    tpu.vector_store %arg5[%c0_11, %c0_12], %12 {strides = array<i32>} : memref<8x16xf32, #tpu.memory_space<vmem>>, vector<8x16xf32>,
    return
  }
}

</mosaic_0001>

<bundles_post_ra>
// kernel: tpu_custom_call.1
= control target key start
LH: loop header
LB: loop body
LE: loop exit
PB: predicated region body
PF: predicated region fallthrough
CT: control target
= control target key end

     0   :  { %s262_s0 = inlined_call_operand.vmem [shape: f32[8,64], index: 0, kind: input, shape index: {}]   ;;  %s263_s1 = inlined_call_operand.vmem [shape: f32[64,128], index: 1, kind: input, shape index: {}]   ;;  %s264_s2 = inlined_call_operand.vmem [shape: f32[1,128], index: 2, kind: input, shape index: {}]   ;;  %s265_s3 = inlined_call_operand.vmem [shape: f32[128,16], index: 3, kind: input, shape index: {}]   ;;  %s266_s4 = inlined_call_operand.vmem [shape: f32[1,16], index: 4, kind: input, shape index: {}]   ;;  %s267_s5 = inlined_call_operand.hbm [shape: f32[8,16], index: 5, kind: output, shape index: {}]  }
   0x1   :  { %v29_v0 = vld [vmem:[%s263_s1 + $0x38] sm:$0xff]  ;;  %v28_v1 = vld [vmem:[%s263_s1 + $0x30] sm:$0xff]  ;;  %v27_v2 = vld [vmem:[%s263_s1 + $0x28] sm:$0xff] }
   0x2   :  { %46 = vmatpush.msra.mxu0 %v29_v0  ;;  %v74_v3 = vld [vmem:[%s265_s3 + $0x78] sm:$0xff]  ;;  %v73_v4 = vld [vmem:[%s265_s3 + $0x70] sm:$0xff]  ;;  %v26_v5 = vld [vmem:[%s263_s1 + $0x20] sm:$0xff] }
   0x3   :  { %79 = vmatpush.msra.mxu1 %v74_v3  ;;  %v72_v6 = vld [vmem:[%s265_s3 + $0x68] sm:$0xff]  ;;  %v25_v7 = vld [vmem:[%s263_s1 + $0x18] sm:$0xff]  ;;  %v71_v8 = vld [vmem:[%s265_s3 + $0x60] sm:$0xff] }
   0x4   :  { %47 = vmatpush.msra.mxu0 %v28_v1  ;;  %v24_v9 = vld [vmem:[%s263_s1 + $0x10] sm:$0xff] }
   0x5   :  { %80 = vmatpush.msra.mxu1 %v73_v4 }
   0x6   :  { %48 = vmatpush.msra.mxu0 %v27_v2 }
   0x7   :  { %81 = vmatpush.msra.mxu1 %v72_v6 }
   0x8   :  { %49 = vmatpush.msra.mxu0 %v26_v5 }
   0x9   :  { %10 = vsyncpa [#allocation3], 0  ;;  %v70_v10 = vld [vmem:[%s265_s3 + $0x58] sm:$0xff]  ;;  %v23_v11 = vld [vmem:[%s263_s1 + $0x8] sm:$0xff]  ;;  %82 = vmatpush.msra.mxu1 %v71_v8  ;;  %vm34_vm0 = vcmask 523264   ;;  %s147_s20 = smov [#allocation2]  }
   0xa   :  { %50 = vmatpush.msra.mxu0 %v25_v7  ;;  %v69_v12 = vld [vmem:[%s265_s3 + $0x50] sm:$0xff]  ;;  %v22_v13 = vld [vmem:[%s263_s1] sm:$0xff]  ;;  %v68_v15 = vld [vmem:[%s265_s3 + $0x48] sm:$0xff]  ;;  %s106_s21 = sshll.u32 %s147_s20, 4  ;;  %s108_s24 = sshll.u32 %s267_s5, 4  ;;  %vm99_vm1 = vcmask 130048   ;;  %s107_s21 = int_to_ptr.vmem [resolvable:$true] %s106_s21  ;;  %s109_s24 = int_to_ptr.hbm [resolvable:$true] %s108_s24 }
   0xb   :  { %83 = vmatpush.msra.mxu1 %v70_v10  ;;  %v21_v14 = vld [vmem:[%s262_s0] sm:$0xff]  ;;  %v66_v17 = vld [vmem:[%s265_s3 + $0x38] sm:$0xff]  ;;  %v65_v18 = vld [vmem:[%s265_s3 + $0x30] sm:$0xff] }
   0xc   :  { %51 = vmatpush.msra.mxu0 %v24_v9  ;;  %v67_v16 = vld [vmem:[%s265_s3 + $0x40] sm:$0xff]  ;;  %v64_v19 = vld [vmem:[%s265_s3 + $0x28] sm:$0xff]  ;;  %v62_v21 = vld [vmem:[%s265_s3 + $0x18] sm:$0xff] }
   0xd   :  { %84 = vmatpush.msra.mxu1 %v69_v12  ;;  %v63_v20 = vld [vmem:[%s265_s3 + $0x20] sm:$0xff]  ;;  %v61_v22 = vld [vmem:[%s265_s3 + $0x10] sm:$0xff]  ;;  %v60_v23 = vld [vmem:[%s265_s3 + $0x8] sm:$0xff] }
   0xe   :  { %52 = vmatpush.msra.mxu0 %v23_v11  ;;  %v59_v24 = vld [vmem:[%s265_s3] sm:$0xff] }
   0xf   :  { %85 = vmatpush.msra.mxu1 %v68_v15  ;;  %v119_v25 = vld [vmem:[%s264_s2] ss:$0 sm:$0xff] }
  0x10   :  { %53 = vmatpush.msra.mxu0 %v22_v13  ;;  %v120_v29 = vld [vmem:[%s266_s4] ss:$0 sm:$0xff] }
  0x11   :  { %117 = vmatmul.msk.f32.vlgmr.msra.gmra.mxu0 %vm34_vm0, %v21_v14  ;;  %86 = vmatpush.msra.mxu1 %v67_v16 }
  0x13   :  { %87 = vmatpush.msra.mxu1 %v66_v17 }
  0x15   :  { %88 = vmatpush.msra.mxu1 %v65_v18 }
  0x17   :  { %89 = vmatpush.msra.mxu1 %v64_v19 }
  0x19   :  { %90 = vmatpush.msra.mxu1 %v63_v20 }
  0x1b   :  { %91 = vmatpush.msra.mxu1 %v62_v21 }
  0x1d   :  { %92 = vmatpush.msra.mxu1 %v61_v22 }
  0x1f   :  { %93 = vmatpush.msra.mxu1 %v60_v23 }
  0x21   :  { %94 = vmatpush.msra.mxu1 %v59_v24 }
  0x8e   :  { %v55_v26 = vpop.f32.mrf.mxu0 }
  0x8f   :  { %v56_v27 = vadd.f32 %v119_v25, %v55_v26 }
  0x91   :  { %v58_v28 = vmax.f32 %v56_v27, 0.0 }
  0x93   :  { %95 = vmatmul.f32.vlgmr.msra.gmra.mxu1 %v58_v28 }
 0x110   :  { %v96_v30 = vpop.f32.mrf.mxu1 }
 0x111   :  { %v97_v31 = vadd.f32 %v120_v29, %v96_v30 }
 0x113   :  { %100 = vst.msk [vmem:[#allocation2] sm:$0xff] %vm99_vm1, %v97_v31 }
 0x114   :  { %111 = dma.vmem_to_hbm [thread:$0]  %s107_s21, 128, %s109_s24, [#allocation3]  }
 0x115   :  { %145 = dma.done.wait [#allocation3], 128  }
 0x116   :  { %146 = vsyncadd [#allocation3], 4294967168 }
 0x117   :  { %116 = vsyncpa [#allocation3], 1 }

</bundles_post_ra>
